<compile_context>
chip_gen: v7x
topology: tpu7x:2x2x1
jax: 0.10.0
libtpu: 0.0.40
codegen_flags: <defaults>
</compile_context>

<pallas_src>
import jax
import jax.numpy as jnp
from jax import lax
from jax.experimental import pallas as pl
from jax.experimental.pallas import tpu as pltpu

MUSCLE_DIM = 12
TARGET_SIZE = 12                                  # population_size of the target encoder
IN_DIM = 15                                       # 12 muscle + 3 target pos
OUT_DIM = MUSCLE_DIM + 2 * TARGET_SIZE + 1        # 37

_VMEM_LIMIT_BYTES = 32 * 1024 * 1024              # explicit; safe on v5e/v6e/v7x
_MAX_TILE_B = 16384                               # lane-axis tile cap (multiple of 128)


def _round_up(n, m):
    return -(-n // m) * m


def _pick_tile(batch, rows_in, rows_out, tile_b=_MAX_TILE_B):
    """Lane-axis (batch) tile: multiple of 128, >= 2 grid steps when B > 128
    (v7x megacore), sized from a VMEM budget for the double-buffered blocks."""
    if batch <= 128:
        return batch                               # single full-dim block
    bytes_per_col = 4 * 2 * (_round_up(rows_in, 8) + _round_up(rows_out, 8))
    budget = _VMEM_LIMIT_BYTES // 4                # headroom for Mosaic temporaries
    cap = max(128, (budget // bytes_per_col) // 128 * 128)
    half = _round_up(-(-batch // 2), 128)          # ceil(B/2) -> at least 2 grid steps
    return max(128, min(tile_b, cap, half))


# --------------------------------------------------------------------------
# Host-side tables (deterministic transcription of the PyTorch constructor)
# --------------------------------------------------------------------------
def build_population_encoder_tables(input_dim, population_size=8,
                                    min_val=-1.0, max_val=1.0,
                                    sigma_factor=0.5):
    """Reproduce PopulationEncoder buffers and build the fused affine matrix E.

    Returns (preferred (D,P), two_sigma_sq (D,), emat (D*P, D+1)) where
    row r = d*P + p of emat encodes  z = s_d * x_d - s_d * pref[d,p],
    s_d = 1/sqrt(2 sigma_d^2), so that exp(-clip((x-pref)^2/2s^2,0,10))
    == exp(max(-z*z, -10)).
    """
    min_val = jnp.broadcast_to(jnp.asarray(min_val, jnp.float32), (input_dim,))
    max_val = jnp.broadcast_to(jnp.asarray(max_val, jnp.float32), (input_dim,))
    preferred = jnp.stack(
        [jnp.linspace(min_val[d], max_val[d], population_size)
         for d in range(input_dim)]
    ).astype(jnp.float32)                                           # (D, P)
    sigma = (max_val - min_val) / (population_size * sigma_factor)  # (D,)
    two_sigma_sq = (2.0 * sigma ** 2).astype(jnp.float32)           # (D,)
    scale = jnp.sqrt(1.0 / two_sigma_sq)                            # (D,)

    D, P = input_dim, population_size
    rows = jnp.arange(D * P)
    dcol = rows // P                                                # feature index per row
    emat = jnp.zeros((D * P, D + 1), jnp.float32)
    emat = emat.at[rows, dcol].set(scale[dcol])
    emat = emat.at[rows, D].set(-scale[dcol] * preferred.reshape(-1))
    return preferred, two_sigma_sq, emat


def build_modality_encoder_table(preferred, two_sigma_sq):
    """Affine matrix for the fused modality encoder: rows 0..11 muscle
    passthrough, 12..35 Gaussian responses to (tx, ty), 36 tz passthrough."""
    scale = jnp.sqrt(1.0 / two_sigma_sq)                            # (2,)
    emat = jnp.zeros((OUT_DIM, IN_DIM + 1), jnp.float32)
    m = jnp.arange(MUSCLE_DIM)
    emat = emat.at[m, m].set(1.0)                                   # muscle passthrough
    p = jnp.arange(TARGET_SIZE)
    emat = emat.at[MUSCLE_DIM + p, MUSCLE_DIM].set(scale[0])        # tx responses
    emat = emat.at[MUSCLE_DIM + p, IN_DIM].set(-scale[0] * preferred[0])
    emat = emat.at[MUSCLE_DIM + TARGET_SIZE + p, MUSCLE_DIM + 1].set(scale[1])
    emat = emat.at[MUSCLE_DIM + TARGET_SIZE + p, IN_DIM].set(-scale[1] * preferred[1])
    emat = emat.at[OUT_DIM - 1, MUSCLE_DIM + 2].set(1.0)            # tz passthrough
    return emat


# --------------------------------------------------------------------------
# Kernel bodies (feature-major: rows = features, lanes = batch)
# --------------------------------------------------------------------------
def _pop_gauss_kernel(xaug_ref, emat_ref, out_ref):
    """xaug_ref: (D+1, TB), emat_ref: (D*P, D+1), out_ref: (D*P, TB)."""
    z = jnp.dot(emat_ref[...], xaug_ref[...],
                precision=lax.Precision.HIGHEST,
                preferred_element_type=jnp.float32)                 # (D*P, TB)
    # sq/2sigma^2 >= 0, so clip(.,0,10) == min(.,10); exp(-min(n,10)) == exp(max(-n,-10))
    out_ref[...] = jnp.exp(jnp.maximum(-(z * z), -10.0))            # single lane-dense store


def _modality_kernel(xaug_ref, emat_ref, out_ref):
    """xaug_ref: (16, TB), emat_ref: (37, 16), out_ref: (37, TB)."""
    z = jnp.dot(emat_ref[...], xaug_ref[...],
                precision=lax.Precision.HIGHEST,
                preferred_element_type=jnp.float32)                 # (37, TB)
    resp = jnp.exp(jnp.maximum(-(z * z), -10.0))
    row = lax.broadcasted_iota(jnp.int32, z.shape, 0)
    is_resp = jnp.logical_and(row >= MUSCLE_DIM,
                              row < MUSCLE_DIM + 2 * TARGET_SIZE)
    out_ref[...] = jnp.where(is_resp, resp, z)                      # single lane-dense store


# --------------------------------------------------------------------------
# pallas_call plumbing
# --------------------------------------------------------------------------
def _call_feature_major(kernel, x_t, emat, out_rows, tile_b):
    """x_t: (D, B) feature-major -> (out_rows, B) feature-major."""
    d, b = x_t.shape
    assert emat.shape == (out_rows, d + 1), (emat.shape, out_rows, d)
    ones = jnp.ones((1, b), jnp.float32)
    x_aug = jnp.concatenate([x_t.astype(jnp.float32), ones], axis=0)   # (D+1, B)
    tb = _pick_tile(b, d + 1, out_rows, tile_b)
    return pl.pallas_call(
        kernel,
        out_shape=jax.ShapeDtypeStruct((out_rows, b), jnp.float32),
        grid=(pl.cdiv(b, tb),),
        in_specs=[
            pl.BlockSpec((d + 1, tb), lambda i: (0, i)),
            pl.BlockSpec((out_rows, d + 1), lambda i: (0, 0)),       # fetched once
        ],
        out_specs=pl.BlockSpec((out_rows, tb), lambda i: (0, i)),
        compiler_params=pltpu.CompilerParams(
            dimension_semantics=("parallel",),
            vmem_limit_bytes=_VMEM_LIMIT_BYTES),
    )(x_aug, emat)


# Feature-major entry points (preferred: no transposes, lane-dense end to end).
def population_encoder_fm(x_t, emat, *, tile_b=_MAX_TILE_B):
    """x_t: (D, B) -> (D*P, B)."""
    return _call_feature_major(_pop_gauss_kernel, x_t, emat, emat.shape[0], tile_b)


def modality_specific_encoder_fm(x_t, emat, *, tile_b=_MAX_TILE_B):
    """x_t: (15, B) -> (37, B) = [muscle | resp(tx) | resp(ty) | tz]."""
    return _call_feature_major(_modality_kernel, x_t, emat, OUT_DIM, tile_b)


# Batch-major wrappers matching the PyTorch module API (layout plumbing only).
def population_encoder(x, emat, *, tile_b=_MAX_TILE_B):
    """x: (B, D) -> (B, D*P), exact forward of PopulationEncoder."""
    return population_encoder_fm(x.T, emat, tile_b=tile_b).T


def modality_specific_encoder(x, emat, *, tile_b=_MAX_TILE_B):
    """x: (B, 15) -> (B, 37)."""
    return modality_specific_encoder_fm(x.T, emat, tile_b=tile_b).T


# --------------------------------------------------------------------------
# Plain-JAX references (transcriptions of the PyTorch forward)
# --------------------------------------------------------------------------
def _population_encoder_ref(x, preferred, two_sigma_sq):
    sq = (x[:, :, None] - preferred[None, :, :]) ** 2
    norm = jnp.clip(sq / two_sigma_sq[None, :, None], 0.0, 10.0)
    return jnp.exp(-norm).reshape(x.shape[0], -1)


def _modality_ref(x, preferred, two_sigma_sq):
    muscle = x[:, :MUSCLE_DIM]
    txy = x[:, MUSCLE_DIM:MUSCLE_DIM + 2]
    tz = x[:, MUSCLE_DIM + 2:MUSCLE_DIM + 3]
    resp = _population_encoder_ref(txy, preferred, two_sigma_sq)
    return jnp.concatenate([muscle, resp, tz], axis=1)


if __name__ == "__main__":
    key = jax.random.PRNGKey(0)
    k1, k2, k3, k4 = jax.random.split(key, 4)
    TOL = dict(atol=2e-5, rtol=2e-5)   # sqrt/HIGHEST-matmul folding is not bit-exact

    # --- 1a) Module defaults (D=3, P=8), single grid step, batch-major API ----
    B1, D1, P1 = 128, 3, 8
    pref1, tss1, emat1 = build_population_encoder_tables(D1, P1)
    x1 = jax.random.normal(k1, (B1, D1), dtype=jnp.float32)
    out1 = jax.block_until_ready(population_encoder(x1, emat1))
    ref1 = _population_encoder_ref(x1, pref1, tss1)
    assert out1.shape == (B1, D1 * P1), out1.shape
    assert jnp.allclose(out1, ref1, **TOL), "pop-enc (defaults) mismatch"

    # --- 1b) Wider encoder (D=15, P=8), tiled lane axis (grid=2, partial last
    #         block), feature-major API (no wrapper transposes) ----------------
    B2, D2, P2 = 400, 15, 8
    pref2, tss2, emat2 = build_population_encoder_tables(
        D2, P2, min_val=-2.0, max_val=2.0)
    x2 = jax.random.normal(k2, (B2, D2), dtype=jnp.float32)
    out2_t = jax.block_until_ready(population_encoder_fm(x2.T, emat2))
    ref2 = _population_encoder_ref(x2, pref2, tss2)
    assert out2_t.shape == (D2 * P2, B2), out2_t.shape
    assert jnp.allclose(out2_t.T, ref2, **TOL), "pop-enc (tiled) mismatch"

    # --- 2) Fused ModalitySpecificEncoder: (B,15) -> (B,37) -------------------
    B3 = 300
    pref3, tss3, _ = build_population_encoder_tables(
        2, TARGET_SIZE, min_val=(-0.65, -0.9), max_val=(0.9, 0.35),
        sigma_factor=1.0)
    emat3 = build_modality_encoder_table(pref3, tss3)
    muscles = jax.random.uniform(k3, (B3, MUSCLE_DIM), dtype=jnp.float32)
    tpos = jax.random.uniform(k4, (B3, 3), dtype=jnp.float32,
                              minval=-0.9, maxval=0.9)
    x3 = jnp.concatenate([muscles, tpos], axis=1)
    out3 = jax.block_until_ready(modality_specific_encoder(x3, emat3))
    ref3 = _modality_ref(x3, pref3, tss3)
    assert out3.shape == (B3, OUT_DIM), out3.shape
    assert jnp.allclose(out3, ref3, **TOL), "modality mismatch"

    print("KERNEL_OK")
</pallas_src>

<mosaic_0001>
module attributes {stable_mosaic.version = 11 : i64} {
  func.func @_pop_gauss_kernel(%arg0: i32, %arg1: memref<4x128xf32, #tpu.memory_space<vmem>>, %arg2: memref<24x4xf32, #tpu.memory_space<vmem>>, %arg3: memref<24x128xf32, #tpu.memory_space<vmem>>) attributes {dimension_semantics = [#tpu.dimension_semantics<parallel>], iteration_bounds = array<i64: 1>, scalar_prefetch = 0 : i64, scratch_operands = 0 : i64, tpu.core_type = #tpu.core_type<tc>, window_params = [{transform_indices = @transform_0, window_bounds = array<i64: 4, 128>}, {pipeline_mode = #tpu.pipeline_mode<synchronous>, transform_indices = @transform_1, window_bounds = array<i64: 24, 4>}, {transform_indices = @transform_2, window_bounds = array<i64: 24, 128>}]} {
    %c0 = arith.constant 0 : index
    %c0_0 = arith.constant 0 : index
    %0 = vector.load %arg2[%c0, %c0_0] : memref<24x4xf32, #tpu.memory_space<vmem>>, vector<24x4xf32>
    %c0_1 = arith.constant 0 : index
    %c0_2 = arith.constant 0 : index
    %1 = vector.load %arg1[%c0_1, %c0_2] : memref<4x128xf32, #tpu.memory_space<vmem>>, vector<4x128xf32>
    %cst = arith.constant dense<0.000000e+00> : vector<24x128xf32>
    %2 = tpu.matmul %0, %1, %cst {dimension_numbers = #tpu.dot_dimension_numbers<[1], [0], [0], [1], [0, 0, 1, 1], [], []>, precision = #tpu.contract_precision<fp32>} : vector<24x4xf32>, vector<4x128xf32>, vector<24x128xf32> -> vector<24x128xf32>
    %3 = arith.mulf %2, %2 : vector<24x128xf32>
    %cst_3 = arith.constant 0.000000e+00 : f32
    %4 = vector.broadcast %cst_3 : f32 to vector<24x128xf32>
    %5 = arith.subf %4, %3 : vector<24x128xf32>
    %cst_4 = arith.constant -1.000000e+01 : f32
    %6 = vector.broadcast %cst_4 : f32 to vector<24x128xf32>
    %7 = arith.maximumf %5, %6 : vector<24x128xf32>
    %8 = math.exp %7 : vector<24x128xf32>
    %c0_5 = arith.constant 0 : index
    %c0_6 = arith.constant 0 : index
    %9 = vector.load %arg3[%c0_5, %c0_6] : memref<24x128xf32, #tpu.memory_space<vmem>>, vector<24x128xf32>
    tpu.vector_store %arg3[%c0_5, %c0_6], %8 {strides = array<i32>} : memref<24x128xf32, #tpu.memory_space<vmem>>, vector<24x128xf32>,
    return
  }
  func.func @transform_0(%arg0: i32) -> (i32, i32) {
    %c0_i32 = arith.constant 0 : i32
    %c0_i32_0 = arith.constant 0 : i32
    return %c0_i32, %arg0 : i32, i32
  }
  func.func @transform_1(%arg0: i32) -> (i32, i32) {
    %c0_i32 = arith.constant 0 : i32
    %c0_i32_0 = arith.constant 0 : i32
    %c0_i32_1 = arith.constant 0 : i32
    return %c0_i32, %c0_i32_0 : i32, i32
  }
  func.func @transform_2(%arg0: i32) -> (i32, i32) {
    %c0_i32 = arith.constant 0 : i32
    %c0_i32_0 = arith.constant 0 : i32
    return %c0_i32, %arg0 : i32, i32
  }
}

</mosaic_0001>

<bundles_post_ra>
// kernel: tpu_custom_call.1
= control target key start
LH: loop header
LB: loop body
LE: loop exit
PB: predicated region body
PF: predicated region fallthrough
CT: control target
= control target key end

     0   :  { %vm26_vm0 = vcmask 1043456   ;;  %v748_v2 = vmov 0.0   ;;  %vm749_vm1 = vmmov 0   ;;  %vm16_vm2 = vcmask 31744   ;;  %s834_s0 = inlined_call_operand.vmem [shape: f32[4,128], index: 0, kind: input, shape index: {}]   ;;  %s835_s1 = inlined_call_operand.vmem [shape: f32[24,4], index: 1, kind: input, shape index: {}]   ;;  %s836_s2 = inlined_call_operand.hbm [shape: f32[24,128], index: 2, kind: output, shape index: {}]  }
   0x1   :  { %v15_v0 = vld [vmem:[%s834_s0] sm:$0xf]  ;;  %653 = vmatprep.subr.mxu0 %v748_v2  ;;  %655 = vmatprep.mubr.msk.f32.mxu0 %vm749_vm1, %v748_v2  ;;  %v13_v4 = vld [vmem:[%s835_s1 + $0x8] sm:$0xff]  ;;  %v14_v5 = vld [vmem:[%s835_s1 + $0x10] sm:$0xff] }
   0x2   :  { %v12_v1 = vld [vmem:[%s835_s1] sm:$0xff]  ;;  %v28_v3 = vsel %vm26_vm0, %v15_v0, 0 }
   0x3   :  { %7 = vsyncpa [#allocation3], 0  ;;  %v31_v6 = vand.u32 4294901760, %v28_v3  ;;  %v18_v7 = vsel %vm16_vm2, %v12_v1, 0  ;;  %620 = vmatprep.subr.mxu1 %v748_v2  ;;  %622 = vmatprep.mubr.msk.f32.mxu1 %vm749_vm1, %v748_v2  ;;  %v21_v8 = vsel %vm16_vm2, %v13_v4, 0  ;;  %v24_v9 = vsel %vm16_vm2, %v14_v5, 0 }
   0x4   :  { %v96_v10 = vand.u32 4294901760, %v18_v7  ;;  %v106_v11 = vand.u32 4294901760, %v21_v8  ;;  %v116_v12 = vand.u32 4294901760, %v24_v9  ;;  %s750_s1 = smov [#allocation2]  }
   0x5   :  { %v128_v13 = vsub.f32 %v28_v3, %v31_v6  ;;  %654 = vmatpush3.msra.mxu0 %v31_v6  ;;  %621 = vmatpush3.msra.mxu1 %v31_v6  ;;  %s585_s16 = sshll.u32 %s750_s1, 4  ;;  %s586_s16 = int_to_ptr.vmem [resolvable:$true] %s585_s16 }
   0x6   :  { %v97_v14 = vsub.f32 %v18_v7, %v96_v10  ;;  %631 = vmatprep.subr.mxu1 %v748_v2  ;;  %664 = vmatprep.subr.mxu0 %v748_v2  ;;  %v107_v15 = vsub.f32 %v21_v8, %v106_v11  ;;  %v117_v16 = vsub.f32 %v24_v9, %v116_v12  ;;  %s724_s17 = scalar_lea.vmem %s586_s16, 384  ;;  %p729_p1 = scmp.lt.s32.totalorder %s586_s16, %s586_s16 }
   0x7   :  { %v129_v17 = vand.u32 4294901760, %v128_v13  ;;  %p725_p0 = scmp.ne.s32.totalorder %s586_s16, %s724_s17  ;;  %p730_p2 = scmp.lt.s32.totalorder %s724_s17, %s724_s17 }
   0x8   :  { %v98_v18 = vand.u32 4294901760, %v97_v14  ;;  %v108_v19 = vand.u32 4294901760, %v107_v15  ;;  %v118_v23 = vand.u32 4294901760, %v117_v16 }
   0x9   :  { %v130_v20 = vsub.f32 %v128_v13, %v129_v17  ;;  %p731_p3 = por %p730_p2, %p729_p1 }
   0xa   :  { %656 = vmatmul.mubr.f32.vlgmr.msra.gmra.mrb[0].mxu0 %v98_v18  ;;  %v99_v21 = vsub.f32 %v97_v14, %v98_v18  ;;  %v109_v22 = vsub.f32 %v107_v15, %v108_v19  ;;  %v119_v27 = vsub.f32 %v117_v16, %v118_v23 }
   0xb   :  { %658 = vmatprep.mubr.msk.f32.mxu0 %vm749_vm1, %v748_v2  ;;  %v131_v24 = vand.u32 4294901760, %v130_v20  ;;  %665 = vmatpush3.msra.mxu0 %v129_v17  ;;  %p732_p4 = pnand %p731_p3, %p725_p0 }
   0xc   :  { %v100_v25 = vand.u32 4294901760, %v99_v21  ;;  %675 = vmatprep.subr.mxu0 %v748_v2  ;;  %v110_v26 = vand.u32 4294901760, %v109_v22  ;;  %v120_v28 = vand.u32 4294901760, %v119_v27 }
   0xe   :  { %623 = vmatmul.mubr.f32.vlgmr.msra.gmra.mrb[0].mxu1 %v100_v25  ;;  %659 = vmatmul.mubr.f32.gmra.mrb[2].mxu0 %v108_v19 }
   0xf   :  { %632 = vmatpush3.msra.mxu1 %v131_v24  ;;  %625 = vmatprep.mubr.msk.f32.mxu1 %vm749_vm1, %v748_v2 }
  0x10   :  { %661 = vmatprep.mubr.msk.f32.mxu0 %vm749_vm1, %v748_v2  ;;  %642 = vmatprep.subr.mxu1 %v748_v2 }
  0x12   :  { %626 = vmatmul.mubr.f32.gmra.mrb[2].mxu1 %v110_v26  ;;  %662 = vmatmul.mubr.f32.gmra.mrb[4].mxu0 %v118_v23 }
  0x13   :  { %628 = vmatprep.mubr.msk.f32.mxu1 %vm749_vm1, %v748_v2  ;;  %666 = vmatprep.mubr.msk.f32.mxu0 %vm749_vm1, %v748_v2 }
  0x16   :  { %629 = vmatmul.mubr.f32.gmra.mrb[4].mxu1 %v120_v28  ;;  %667 = vmatmul.mubr.f32.vlgmr.msra.gmra.mrb[0].mxu0 %v96_v10 }
  0x17   :  { %633 = vmatprep.mubr.msk.f32.mxu1 %vm749_vm1, %v748_v2  ;;  %669 = vmatprep.mubr.msk.f32.mxu0 %vm749_vm1, %v748_v2 }
  0x18   :  { %676 = vmatpush3.msra.mxu0 %v31_v6 }
  0x1a   :  { %634 = vmatmul.mubr.f32.vlgmr.msra.gmra.mrb[0].mxu1 %v96_v10  ;;  %670 = vmatmul.mubr.f32.gmra.mrb[2].mxu0 %v106_v11 }
  0x1b   :  { %643 = vmatpush3.msra.mxu1 %v128_v13  ;;  %636 = vmatprep.mubr.msk.f32.mxu1 %vm749_vm1, %v748_v2 }
  0x1c   :  { %672 = vmatprep.mubr.msk.f32.mxu0 %vm749_vm1, %v748_v2 }
  0x1e   :  { %637 = vmatmul.mubr.f32.gmra.mrb[2].mxu1 %v106_v11  ;;  %673 = vmatmul.mubr.f32.gmra.mrb[4].mxu0 %v116_v12 }
  0x1f   :  { %639 = vmatprep.mubr.msk.f32.mxu1 %vm749_vm1, %v748_v2  ;;  %677 = vmatprep.mubr.msk.f32.mxu0 %vm749_vm1, %v748_v2 }
  0x22   :  { %640 = vmatmul.mubr.f32.gmra.mrb[4].mxu1 %v116_v12  ;;  %678 = vmatmul.mubr.f32.vlgmr.msra.gmra.mrb[0].mxu0 %v96_v10 }
  0x23   :  { %644 = vmatprep.mubr.msk.f32.mxu1 %vm749_vm1, %v748_v2  ;;  %680 = vmatprep.mubr.msk.f32.mxu0 %vm749_vm1, %v748_v2 }
  0x26   :  { %645 = vmatmul.mubr.f32.vlgmr.msra.gmra.mrb[0].mxu1 %v97_v14  ;;  %681 = vmatmul.mubr.f32.gmra.mrb[2].mxu0 %v106_v11 }
  0x27   :  { %647 = vmatprep.mubr.msk.f32.mxu1 %vm749_vm1, %v748_v2  ;;  %683 = vmatprep.mubr.msk.f32.mxu0 %vm749_vm1, %v748_v2 }
  0x2a   :  { %648 = vmatmul.mubr.f32.gmra.mrb[2].mxu1 %v107_v15  ;;  %684 = vmatmul.mubr.f32.gmra.mrb[4].mxu0 %v116_v12 }
  0x2b   :  { %650 = vmatprep.mubr.msk.f32.mxu1 %vm749_vm1, %v748_v2 }
  0x2e   :  { %651 = vmatmul.mubr.f32.gmra.mrb[4].mxu1 %v117_v16 }
  0xf5   :  { %v546_v29 = vpop.f32.mrb[0].mxu0 }
  0xf6   :  { %v679_v30 = vpop.f32.mrb[1].mxu0 }
  0xf9   :  { %v284_v31 = vpop.f32.mrb[0].mxu1  ;;  %v552_v32 = vpop.f32.mrb[2].mxu0 }
  0xfa   :  { %v686_v33 = vadd.f32 %v546_v29, %v284_v31  ;;  %v646_v34 = vpop.f32.mrb[1].mxu1  ;;  %v682_v35 = vpop.f32.mrb[3].mxu0 }
  0xfc   :  { %v562_v36 = vmul.f32 %v686_v33, %v686_v33 }
  0xfd   :  { %v291_v37 = vpop.f32.mrb[2].mxu1  ;;  %v558_v38 = vpop.f32.mrb[4].mxu0 }
  0xfe   :  { %v565_v39 = vsub.f32 0.0, %v562_v36  ;;  %v687_v40 = vadd.f32 %v552_v32, %v291_v37  ;;  %v649_v41 = vpop.f32.mrb[3].mxu1  ;;  %v685_v42 = vpop.f32.mrb[5].mxu0 }
 0x100   :  { %v568_v43 = vmax.f32 %v565_v39, -10.0  ;;  %v563_v44 = vmul.f32 %v687_v40, %v687_v40 }
 0x101   :  { %v298_v45 = vpop.f32.mrb[4].mxu1 }
 0x102   :  { %v571_v46 = vmul.f32 1.442695, %v568_v43  ;;  %v566_v47 = vsub.f32 0.0, %v563_v44  ;;  %v688_v48 = vadd.f32 %v558_v38, %v298_v45  ;;  %v652_v49 = vpop.f32.mrb[5].mxu1 }
 0x104   :  { %718 = vpow2.f32 %v571_v46  ;;  %v569_v50 = vmax.f32 %v566_v47, -10.0  ;;  %v564_v51 = vmul.f32 %v688_v48, %v688_v48 }
 0x106   :  { %v573_v52 = vmul.f32 1.442695, %v569_v50  ;;  %v567_v53 = vsub.f32 0.0, %v564_v51 }
 0x108   :  { %720 = vpow2.f32 %v573_v52  ;;  %v570_v54 = vmax.f32 %v567_v53, -10.0 }
 0x10a   :  { %v575_v55 = vmul.f32 1.442695, %v570_v54 }
 0x10c   :  { %722 = vpow2.f32 %v575_v55 }
 0x10e   :  { %v719_v56 = vpop.eup %718 }
 0x10f   :  { %577 = vst [vmem:[#allocation2] sm:$0xff] %v719_v56 }
 0x112   :  { %v721_v57 = vpop.eup %720 }
 0x113   :  { %578 = vst [vmem:[#allocation2 + $0x8] sm:$0xff] %v721_v57 }
 0x116   :  { %v723_v58 = vpop.eup %722 }
 0x117   :  { %579 = vst [vmem:[#allocation2 + $0x10] sm:$0xff] %v723_v58 }
 0x118   :  { %735 = shalt.err (!%p732_p4)
}
 0x119   :  { %s736_s20 = scalar_lea.hbm %s836_s2, 384 }
 0x11a   :  { %p737_p5 = scmp.ne.s32.totalorder %s836_s2, %s736_s20  ;;  %p740_p6 = scmp.lt.u32.totalorder %s736_s20, %s836_s2 }
 0x11c   :  { %p742_p7 = pnand %p740_p6, %p737_p5 }
 0x11e   :  { %745 = shalt.err (!%p742_p7)
}
 0x11f   :  { %s751_s25 = smov 128   ;;  %s752_s26 = smov 8  }
 0x120   :  { %591 = dma.vmem_to_hbm [thread:$0]  %s586_s16, 384, %s836_s2, [#allocation3], %s751_s25, %s751_s25, %s752_s26  }
 0x121   :  { %746 = dma.done.wait [#allocation3], 384  }
 0x122   :  { %747 = vsyncadd [#allocation3], 4294966912 }
 0x123   :  { %595 = vsyncpa [#allocation3], 1 }

</bundles_post_ra>
